<compile_context>
chip_gen: v6e
topology: v6e:2x2x1
jax: 0.10.0
libtpu: 0.0.40
codegen_flags: <defaults>
</compile_context>

<pallas_src>
import functools

import jax
import jax.numpy as jnp
from jax.experimental import pallas as pl
from jax.experimental.pallas import tpu as pltpu


def _round_up(v, m):
    return (v + m - 1) // m * m


# --------------------------------------------------------------------------------------
# Kernel
# --------------------------------------------------------------------------------------
def _attention_kernel(x_ref, ctx_ref, wq_ref, wk_ref, wv_ref, wo_ref, bo_ref,
                      o_ref, acc_ref, *, batch, n, m):
    # x_ref  : (Bt*N, Dqp)          ctx_ref     : (Bt*M, Dcp)
    # wq_ref : (Dqp, dhp)           wk/wv_ref   : (Dcp, dhp)   (Wq pre-scaled by dh**-0.5)
    # wo_ref : (dhp, Dqp)           bo_ref      : (1, Dqp)
    # o_ref  : (Bt*N, Dqp)          acc_ref     : (Bt*N, Dqp) f32 VMEM scratch
    h = pl.program_id(1)
    f32 = jnp.float32

    @pl.when(h == 0)
    def _():
        acc_ref[...] = jnp.zeros_like(acc_ref)

    x = x_ref[...]          # activation dtype (f32 here; bf16 stays bf16)
    c = ctx_ref[...]
    cd = x.dtype

    # Per-head projections: lane-dense MXU matmuls (Dqp/Dcp and dhp are multiples of 128).
    q = jnp.dot(x, wq_ref[...], preferred_element_type=f32)      # (Bt*N, dhp)
    k = jnp.dot(c, wk_ref[...], preferred_element_type=f32)      # (Bt*M, dhp)
    v = jnp.dot(c, wv_ref[...], preferred_element_type=f32)      # (Bt*M, dhp)

    q3 = q.astype(cd).reshape(batch, n, -1)                      # (Bt, N, dhp)
    k3 = k.astype(cd).reshape(batch, m, -1)                      # (Bt, M, dhp)
    v3 = v.astype(cd).reshape(batch, m, -1)                      # (Bt, M, dhp)

    # Scores: contract the zero-padded head dim directly (no explicit K transpose);
    # softmax math stays f32.
    sim = jnp.einsum('bnd,bmd->bnm', q3, k3,
                     preferred_element_type=f32)                 # (Bt, N, M)
    sim = sim - jnp.max(sim, axis=-1, keepdims=True)
    p = jnp.exp(sim)
    attn = p * pl.reciprocal(jnp.sum(p, axis=-1, keepdims=True), approx=True)
    out_h = jnp.einsum('bnm,bmd->bnd', attn.astype(cd), v3,
                       preferred_element_type=f32)               # (Bt, N, dhp)

    # Per-head output projection, accumulated into the resident f32 scratch.
    acc_ref[...] += jnp.dot(out_h.reshape(batch * n, -1).astype(wo_ref.dtype),
                            wo_ref[...], preferred_element_type=f32)

    @pl.when(h == pl.num_programs(1) - 1)
    def _():
        o_ref[...] = (acc_ref[...] + bo_ref[...].astype(f32)).astype(o_ref.dtype)

    # TODO(synk): optional `mask` (masked_fill with -finfo.max before softmax) is not
    #             wired in; only the module's default mask=None path is implemented.
    # TODO(synk): for very long contexts add an M grid axis with an online-softmax
    #             (m_i / l_i / acc scratch) instead of the full (Bt, N, M) score tile.
    # TODO(synk): on v7x the projection weights could be fed as fp8 to halve weight DMA.


# --------------------------------------------------------------------------------------
# One-time weight preparation (hoisted out of the forward path)
# --------------------------------------------------------------------------------------
def prepare_attention_params(wq, wkv, wo, bo, *, heads, dim_head):
    """Pad / scale / split / head-major-reorganize the weights ONCE."""
    Dq = wq.shape[0]
    Dc = wkv.shape[0]
    inner = heads * dim_head
    assert wq.shape == (Dq, inner)
    assert wkv.shape == (Dc, 2 * inner)
    assert wo.shape == (inner, Dq)
    assert bo.shape == (Dq,)

    scale = float(dim_head) ** (-0.5)
    Dqp = _round_up(Dq, 128)
    Dcp = _round_up(Dc, 128)
    dhp = _round_up(dim_head, 128)

    def pad_in_proj(w, din, dinp):
        # (din, heads*dim_head) -> (dinp, heads*dhp): per-head zero-pad dim_head -> dhp.
        w = w.reshape(din, heads, dim_head)
        w = jnp.pad(w, ((0, dinp - din), (0, 0), (0, dhp - dim_head)))
        return w.reshape(dinp, heads * dhp)

    wq_p = pad_in_proj(wq * scale, Dq, Dqp)               # scale folded into Wq
    wk_p = pad_in_proj(wkv[:, :inner], Dc, Dcp)
    wv_p = pad_in_proj(wkv[:, inner:], Dc, Dcp)

    wo_h = wo.reshape(heads, dim_head, Dq)
    wo_p = jnp.pad(wo_h, ((0, 0), (0, dhp - dim_head), (0, Dqp - Dq)))
    wo_p = wo_p.reshape(heads * dhp, Dqp)
    bo_p = jnp.pad(bo, (0, Dqp - Dq)).reshape(1, Dqp)

    return dict(wq=wq_p, wk=wk_p, wv=wv_p, wo=wo_p, bo=bo_p,
                heads=heads, dim_head=dim_head, dhp=dhp,
                Dq=Dq, Dc=Dc, Dqp=Dqp, Dcp=Dcp)


# --------------------------------------------------------------------------------------
# Batch-tile selection
# --------------------------------------------------------------------------------------
def _pick_block_batch(B, N, M, per_seq_bytes, budget_bytes):
    """Largest Bt dividing B that fits the VMEM budget, respects the sublane constraint
    on (Bt*N, .) / (Bt*M, .) blocks, and (when possible) keeps the batch grid axis >= 2
    so the 'parallel' axis can shard across v7x's two TensorCores."""
    def ok(bt):
        return bt == B or ((bt * N) % 8 == 0 and (bt * M) % 8 == 0)

    divisors = [bt for bt in range(B, 0, -1) if B % bt == 0 and ok(bt)]
    fits = [bt for bt in divisors if bt * per_seq_bytes <= budget_bytes]
    if not fits:
        fits = [divisors[-1]]
    multi_core = [bt for bt in fits if B // bt >= 2]
    return max(multi_core) if multi_core else max(fits)


# --------------------------------------------------------------------------------------
# Forward wrapper
# --------------------------------------------------------------------------------------
def attention_forward(x, context, params, *, block_batch=None):
    """x: (B, N, Dq), context: (B, M, Dc) -> (B, N, Dq)."""
    B, N, Dq = x.shape
    _, M, Dc = context.shape
    heads = params['heads']
    dhp, Dqp, Dcp = params['dhp'], params['Dqp'], params['Dcp']
    assert Dq == params['Dq'] and Dc == params['Dc']

    isz = jnp.dtype(x.dtype).itemsize
    wsz = jnp.dtype(params['wq'].dtype).itemsize

    # Generation-aware VMEM budget: ~78% of physical VMEM
    # (≈100 MiB on v5e/v6e's 128 MiB, ≈50 MiB on v7x's 64 MiB -> headroom for compiler scratch).
    try:
        vmem_cap = int(pltpu.get_tpu_info().vmem_capacity_bytes)
    except Exception:
        vmem_cap = 128 * 1024 * 1024
    vmem_limit = int(vmem_cap * 0.78)

    # Double-buffered per-head weight blocks + bias.
    w_bytes = 2 * (Dqp * dhp + 2 * Dcp * dhp + dhp * Dqp + Dqp) * wsz
    # Per batch-element bytes per grid step: double-buffered activation blocks, one
    # head's f32 q/k/v (+ activation-dtype copies), score tile, out_h, and acc scratch.
    per_seq = (2 * (2 * N * Dqp + M * Dcp) * isz
               + (N + 2 * M) * dhp * (4 + isz)
               + 3 * N * M * 4
               + N * dhp * 4
               + N * Dqp * 4)
    budget = max(vmem_limit - w_bytes - (4 << 20), per_seq)

    if block_batch is None:
        block_batch = _pick_block_batch(B, N, M, per_seq, budget)
    Bt = block_batch
    assert B % Bt == 0, "block_batch must divide the batch size"

    # Activations as lane-dense 2-D slabs (feature dims padded to 128).
    x_p = jnp.pad(x, ((0, 0), (0, 0), (0, Dqp - Dq))).reshape(B * N, Dqp)
    c_p = jnp.pad(context, ((0, 0), (0, 0), (0, Dcp - Dc))).reshape(B * M, Dcp)

    kernel = functools.partial(_attention_kernel, batch=Bt, n=N, m=M)

    out_flat = pl.pallas_call(
        kernel,
        out_shape=jax.ShapeDtypeStruct((B * N, Dqp), x.dtype),
        grid_spec=pltpu.PrefetchScalarGridSpec(
            num_scalar_prefetch=0,
            grid=(B // Bt, heads),                               # reduction (heads) axis last
            in_specs=[
                pl.BlockSpec((Bt * N, Dqp), lambda b, h: (b, 0)),   # x     (const along h)
                pl.BlockSpec((Bt * M, Dcp), lambda b, h: (b, 0)),   # ctx   (const along h)
                pl.BlockSpec((Dqp, dhp), lambda b, h: (0, h)),      # Wq[h]
                pl.BlockSpec((Dcp, dhp), lambda b, h: (0, h)),      # Wk[h]
                pl.BlockSpec((Dcp, dhp), lambda b, h: (0, h)),      # Wv[h]
                pl.BlockSpec((dhp, Dqp), lambda b, h: (h, 0)),      # Wo[h]
                pl.BlockSpec((1, Dqp), lambda b, h: (0, 0)),        # bo    (grid-invariant)
            ],
            out_specs=pl.BlockSpec((Bt * N, Dqp), lambda b, h: (b, 0)),
            scratch_shapes=[pltpu.VMEM((Bt * N, Dqp), jnp.float32)],
        ),
        compiler_params=pltpu.CompilerParams(
            dimension_semantics=("parallel", "arbitrary"),
            vmem_limit_bytes=vmem_limit),
    )(x_p, c_p, params['wq'], params['wk'], params['wv'], params['wo'], params['bo'])

    return out_flat.reshape(B, N, Dqp)[:, :, :Dq]


# --------------------------------------------------------------------------------------
# Pure-JAX reference (mirrors the PyTorch forward, mask=None, dropout=0)
# --------------------------------------------------------------------------------------
def attention_reference(x, context, wq, wkv, wo, bo, *, heads, dim_head):
    B, N, Dq = x.shape
    _, M, _ = context.shape
    inner = heads * dim_head
    scale = float(dim_head) ** (-0.5)

    q = x @ wq                      # (B, N, inner)
    kv = context @ wkv              # (B, M, 2*inner)
    k, v = kv[..., :inner], kv[..., inner:]

    def split(t, n):
        return t.reshape(B, n, heads, dim_head).transpose(0, 2, 1, 3)  # (B, H, n, dh)

    qh, kh, vh = split(q, N), split(k, M), split(v, M)
    sim = jnp.einsum('bhid,bhjd->bhij', qh, kh) * scale
    attn = jax.nn.softmax(sim, axis=-1)
    out = jnp.einsum('bhij,bhjd->bhid', attn, vh)        # (B, H, N, dh)
    out = out.transpose(0, 2, 1, 3).reshape(B, N, inner)
    return out @ wo + bo


if __name__ == "__main__":
    # Small, module-consistent shapes.
    B, N, M = 2, 8, 8
    query_dim, context_dim = 32, 32
    heads, dim_head = 2, 16
    inner = heads * dim_head

    key = jax.random.PRNGKey(0)
    kx, kc, k1, k2, k3, k4 = jax.random.split(key, 6)

    x = jax.random.normal(kx, (B, N, query_dim), dtype=jnp.float32)
    context = jax.random.normal(kc, (B, M, context_dim), dtype=jnp.float32)

    # Deterministic synthetic parameters (math layout, see header).
    wq = 0.02 * jax.random.normal(k1, (query_dim, inner), dtype=jnp.float32)
    wkv = 0.02 * jax.random.normal(k2, (context_dim, 2 * inner), dtype=jnp.float32)
    wo = 0.02 * jax.random.normal(k3, (inner, query_dim), dtype=jnp.float32)
    bo = 0.02 * jax.random.normal(k4, (query_dim,), dtype=jnp.float32)

    # Weight prep (scale / split / pad / head-major) done ONCE, outside the forward path.
    params = prepare_attention_params(wq, wkv, wo, bo, heads=heads, dim_head=dim_head)

    out = attention_forward(x, context, params)
    out = jax.block_until_ready(out)

    ref = attention_reference(x, context, wq, wkv, wo, bo,
                              heads=heads, dim_head=dim_head)
    assert out.shape == (B, N, query_dim)
    # Tolerance covers the EUP approximate-reciprocal softmax denominator.
    assert jnp.allclose(out, ref, atol=2e-3, rtol=2e-3), "mismatch vs JAX reference"

    print("KERNEL_OK")
</pallas_src>

<mosaic_0001>
module attributes {stable_mosaic.version = 11 : i64} {
  func.func @_attention_kernel(%arg0: i32, %arg1: i32, %arg2: memref<8x128xf32, #tpu.memory_space<vmem>>, %arg3: memref<8x128xf32, #tpu.memory_space<vmem>>, %arg4: memref<128x128xf32, #tpu.memory_space<vmem>>, %arg5: memref<128x128xf32, #tpu.memory_space<vmem>>, %arg6: memref<128x128xf32, #tpu.memory_space<vmem>>, %arg7: memref<128x128xf32, #tpu.memory_space<vmem>>, %arg8: memref<1x128xf32, #tpu.memory_space<vmem>>, %arg9: memref<8x128xf32, #tpu.memory_space<vmem>>, %arg10: memref<8x128xf32, #tpu.memory_space<vmem>>) attributes {dimension_semantics = [#tpu.dimension_semantics<parallel>, #tpu.dimension_semantics<arbitrary>], iteration_bounds = array<i64: 2, 2>, scalar_prefetch = 0 : i64, scratch_operands = 1 : i64, tpu.core_type = #tpu.core_type<tc>, window_params = [{transform_indices = @transform_0, window_bounds = array<i64: 8, 128>}, {transform_indices = @transform_1, window_bounds = array<i64: 8, 128>}, {transform_indices = @transform_2, window_bounds = array<i64: 128, 128>}, {transform_indices = @transform_3, window_bounds = array<i64: 128, 128>}, {transform_indices = @transform_4, window_bounds = array<i64: 128, 128>}, {transform_indices = @transform_5, window_bounds = array<i64: 128, 128>}, {pipeline_mode = #tpu.pipeline_mode<synchronous>, transform_indices = @transform_6, window_bounds = array<i64: 1, 128>}, {transform_indices = @transform_7, window_bounds = array<i64: 8, 128>}]} {
    %c0_i32 = arith.constant 0 : i32
    %0 = arith.cmpi eq, %arg1, %c0_i32 : i32
    %1 = arith.extui %0 : i1 to i32
    %c0_i32_0 = arith.constant 0 : i32
    %2 = arith.cmpi ne, %1, %c0_i32_0 : i32
    scf.if %2 {
      %cst_24 = arith.constant 0.000000e+00 : f32
      %35 = vector.broadcast %cst_24 : f32 to vector<8x128xf32>
      %c0_25 = arith.constant 0 : index
      %c0_26 = arith.constant 0 : index
      %36 = vector.load %arg10[%c0_25, %c0_26] : memref<8x128xf32, #tpu.memory_space<vmem>>, vector<8x128xf32>
      tpu.vector_store %arg10[%c0_25, %c0_26], %35 {strides = array<i32>} : memref<8x128xf32, #tpu.memory_space<vmem>>, vector<8x128xf32>,
    } else {
    }
    %c0 = arith.constant 0 : index
    %c0_1 = arith.constant 0 : index
    %3 = vector.load %arg2[%c0, %c0_1] : memref<8x128xf32, #tpu.memory_space<vmem>>, vector<8x128xf32>
    %c0_2 = arith.constant 0 : index
    %c0_3 = arith.constant 0 : index
    %4 = vector.load %arg3[%c0_2, %c0_3] : memref<8x128xf32, #tpu.memory_space<vmem>>, vector<8x128xf32>
    %c0_4 = arith.constant 0 : index
    %c0_5 = arith.constant 0 : index
    %5 = vector.load %arg4[%c0_4, %c0_5] : memref<128x128xf32, #tpu.memory_space<vmem>>, vector<128x128xf32>
    %cst = arith.constant dense<0.000000e+00> : vector<8x128xf32>
    %6 = tpu.matmul %3, %5, %cst {dimension_numbers = #tpu.dot_dimension_numbers<[1], [0], [0], [1], [0, 0, 1, 1], [], []>} : vector<8x128xf32>, vector<128x128xf32>, vector<8x128xf32> -> vector<8x128xf32>
    %c0_6 = arith.constant 0 : index
    %c0_7 = arith.constant 0 : index
    %7 = vector.load %arg5[%c0_6, %c0_7] : memref<128x128xf32, #tpu.memory_space<vmem>>, vector<128x128xf32>
    %cst_8 = arith.constant dense<0.000000e+00> : vector<8x128xf32>
    %8 = tpu.matmul %4, %7, %cst_8 {dimension_numbers = #tpu.dot_dimension_numbers<[1], [0], [0], [1], [0, 0, 1, 1], [], []>} : vector<8x128xf32>, vector<128x128xf32>, vector<8x128xf32> -> vector<8x128xf32>
    %c0_9 = arith.constant 0 : index
    %c0_10 = arith.constant 0 : index
    %9 = vector.load %arg6[%c0_9, %c0_10] : memref<128x128xf32, #tpu.memory_space<vmem>>, vector<128x128xf32>
    %cst_11 = arith.constant dense<0.000000e+00> : vector<8x128xf32>
    %10 = tpu.matmul %4, %9, %cst_11 {dimension_numbers = #tpu.dot_dimension_numbers<[1], [0], [0], [1], [0, 0, 1, 1], [], []>} : vector<8x128xf32>, vector<128x128xf32>, vector<8x128xf32> -> vector<8x128xf32>
    %11 = vector.shape_cast %6 : vector<8x128xf32> to vector<1x8x128xf32>
    %12 = vector.shape_cast %8 : vector<8x128xf32> to vector<1x8x128xf32>
    %13 = vector.shape_cast %10 : vector<8x128xf32> to vector<1x8x128xf32>
    "tpu.trace_start"() <{level = 10 : i32, message = "bnd,bmd->bnm"}> : () -> ()
    %cst_12 = arith.constant dense<0.000000e+00> : vector<1x8x8xf32>
    %14 = tpu.matmul %11, %12, %cst_12 {dimension_numbers = #tpu.dot_dimension_numbers<[2], [2], [1], [1], [0, 0, 0, 1, 1, 1], [0], [0]>} : vector<1x8x128xf32>, vector<1x8x128xf32>, vector<1x8x8xf32> -> vector<1x8x8xf32>
    "tpu.trace_stop"() : () -> ()
    %cst_13 = arith.constant dense<0xFF800000> : vector<1x8xf32>
    %15 = vector.multi_reduction <maximumf>, %14, %cst_13 [2] : vector<1x8x8xf32> to vector<1x8xf32>
    %16 = vector.shape_cast %15 : vector<1x8xf32> to vector<1x8x1xf32>
    %17 = vector.broadcast %16 : vector<1x8x1xf32> to vector<1x8x8xf32>
    %18 = arith.subf %14, %17 : vector<1x8x8xf32>
    %19 = math.exp %18 : vector<1x8x8xf32>
    %cst_14 = arith.constant dense<0.000000e+00> : vector<1x8xf32>
    %20 = vector.multi_reduction <add>, %19, %cst_14 [2] : vector<1x8x8xf32> to vector<1x8xf32>
    %21 = vector.shape_cast %20 : vector<1x8xf32> to vector<1x8x1xf32>
    %22 = tpu.reciprocal %21 {approx = true} : vector<1x8x1xf32> -> vector<1x8x1xf32>
    %23 = vector.broadcast %22 : vector<1x8x1xf32> to vector<1x8x8xf32>
    %24 = arith.mulf %19, %23 : vector<1x8x8xf32>
    "tpu.trace_start"() <{level = 10 : i32, message = "bnm,bmd->bnd"}> : () -> ()
    %cst_15 = arith.constant dense<0.000000e+00> : vector<1x8x128xf32>
    %25 = tpu.matmul %24, %13, %cst_15 {dimension_numbers = #tpu.dot_dimension_numbers<[2], [1], [1], [2], [0, 0, 0, 1, 1, 2], [0], [0]>} : vector<1x8x8xf32>, vector<1x8x128xf32>, vector<1x8x128xf32> -> vector<1x8x128xf32>
    "tpu.trace_stop"() : () -> ()
    %c0_16 = arith.constant 0 : index
    %c0_17 = arith.constant 0 : index
    %26 = vector.load %arg10[%c0_16, %c0_17] : memref<8x128xf32, #tpu.memory_space<vmem>>, vector<8x128xf32>
    %27 = vector.shape_cast %25 : vector<1x8x128xf32> to vector<8x128xf32>
    %c0_18 = arith.constant 0 : index
    %c0_19 = arith.constant 0 : index
    %28 = vector.load %arg7[%c0_18, %c0_19] : memref<128x128xf32, #tpu.memory_space<vmem>>, vector<128x128xf32>
    %cst_20 = arith.constant dense<0.000000e+00> : vector<8x128xf32>
    %29 = tpu.matmul %27, %28, %cst_20 {dimension_numbers = #tpu.dot_dimension_numbers<[1], [0], [0], [1], [0, 0, 1, 1], [], []>} : vector<8x128xf32>, vector<128x128xf32>, vector<8x128xf32> -> vector<8x128xf32>
    %30 = arith.addf %26, %29 : vector<8x128xf32>
    %c0_21 = arith.constant 0 : index
    %c0_22 = arith.constant 0 : index
    %31 = vector.load %arg10[%c0_21, %c0_22] : memref<8x128xf32, #tpu.memory_space<vmem>>, vector<8x128xf32>
    tpu.vector_store %arg10[%c0_21, %c0_22], %30 {strides = array<i32>} : memref<8x128xf32, #tpu.memory_space<vmem>>, vector<8x128xf32>,
    %c1_i32 = arith.constant 1 : i32
    %32 = arith.cmpi eq, %arg1, %c1_i32 : i32
    %33 = arith.extui %32 : i1 to i32
    %c0_i32_23 = arith.constant 0 : i32
    %34 = arith.cmpi ne, %33, %c0_i32_23 : i32
    scf.if %34 {
      %c0_24 = arith.constant 0 : index
      %c0_25 = arith.constant 0 : index
      %35 = vector.load %arg10[%c0_24, %c0_25] : memref<8x128xf32, #tpu.memory_space<vmem>>, vector<8x128xf32>
      %c0_26 = arith.constant 0 : index
      %c0_27 = arith.constant 0 : index
      %36 = vector.load %arg8[%c0_26, %c0_27] : memref<1x128xf32, #tpu.memory_space<vmem>>, vector<1x128xf32>
      %37 = vector.broadcast %36 : vector<1x128xf32> to vector<8x128xf32>
      %38 = arith.addf %35, %37 : vector<8x128xf32>
      %c0_28 = arith.constant 0 : index
      %c0_29 = arith.constant 0 : index
      %39 = vector.load %arg9[%c0_28, %c0_29] : memref<8x128xf32, #tpu.memory_space<vmem>>, vector<8x128xf32>
      tpu.vector_store %arg9[%c0_28, %c0_29], %38 {strides = array<i32>} : memref<8x128xf32, #tpu.memory_space<vmem>>, vector<8x128xf32>,
    } else {
    }
    return
  }
  func.func @transform_0(%arg0: i32, %arg1: i32) -> (i32, i32) {
    %c0_i32 = arith.constant 0 : i32
    %c0_i32_0 = arith.constant 0 : i32
    return %arg0, %c0_i32 : i32, i32
  }
  func.func @transform_1(%arg0: i32, %arg1: i32) -> (i32, i32) {
    %c0_i32 = arith.constant 0 : i32
    %c0_i32_0 = arith.constant 0 : i32
    return %arg0, %c0_i32 : i32, i32
  }
  func.func @transform_2(%arg0: i32, %arg1: i32) -> (i32, i32) {
    %c0_i32 = arith.constant 0 : i32
    %c0_i32_0 = arith.constant 0 : i32
    return %c0_i32, %arg1 : i32, i32
  }
  func.func @transform_3(%arg0: i32, %arg1: i32) -> (i32, i32) {
    %c0_i32 = arith.constant 0 : i32
    %c0_i32_0 = arith.constant 0 : i32
    return %c0_i32, %arg1 : i32, i32
  }
  func.func @transform_4(%arg0: i32, %arg1: i32) -> (i32, i32) {
    %c0_i32 = arith.constant 0 : i32
    %c0_i32_0 = arith.constant 0 : i32
    return %c0_i32, %arg1 : i32, i32
  }
  func.func @transform_5(%arg0: i32, %arg1: i32) -> (i32, i32) {
    %c0_i32 = arith.constant 0 : i32
    %c0_i32_0 = arith.constant 0 : i32
    return %arg1, %c0_i32 : i32, i32
  }
  func.func @transform_6(%arg0: i32, %arg1: i32) -> (i32, i32) {
    %c0_i32 = arith.constant 0 : i32
    %c0_i32_0 = arith.constant 0 : i32
    %c0_i32_1 = arith.constant 0 : i32
    return %c0_i32, %c0_i32_0 : i32, i32
  }
  func.func @transform_7(%arg0: i32, %arg1: i32) -> (i32, i32) {
    %c0_i32 = arith.constant 0 : i32
    %c0_i32_0 = arith.constant 0 : i32
    return %arg0, %c0_i32 : i32, i32
  }
}

</mosaic_0001>

<bundles_post_ra>
// kernel: tpu_custom_call.1
= control target key start
LH: loop header
LB: loop body
LE: loop exit
PB: predicated region body
PF: predicated region fallthrough
CT: control target
= control target key end

     0   :  { %s2499_s0 = inlined_call_operand.hbm [shape: f32[16,128], index: 0, kind: input, shape index: {}]   ;;  %s2500_s1 = inlined_call_operand.hbm [shape: f32[16,128], index: 1, kind: input, shape index: {}]   ;;  %s2501_s2 = inlined_call_operand.hbm [shape: f32[128,256], index: 2, kind: input, shape index: {}]   ;;  %s2502_s3 = inlined_call_operand.hbm [shape: f32[128,256], index: 3, kind: input, shape index: {}]   ;;  %s2503_s4 = inlined_call_operand.hbm [shape: f32[128,256], index: 4, kind: input, shape index: {}]   ;;  %s2504_s5 = inlined_call_operand.hbm [shape: f32[256,128], index: 5, kind: input, shape index: {}]   ;;  %s2505_s6 = inlined_call_operand.vmem [shape: f32[1,128], index: 6, kind: input, shape index: {}]   ;;  %s2506_s7 = inlined_call_operand.hbm [shape: f32[16,128], index: 7, kind: output, shape index: {}]  }
   0x1   :  { %2531 = sst [smem:[#allocation37_spill]] %s2500_s1 }
   0x2   :  { %2532 = sst [smem:[#allocation38_spill]] %s2502_s3 }
   0x3   :  { %2533 = sst [smem:[#allocation39_spill]] %s2504_s5 }
   0x4   :  { %2534 = sst [smem:[#allocation40_spill]] %s2505_s6 }
   0x5   :  { %2535 = sst [smem:[#allocation41_spill]] %s2506_s7 }
   0x6   :  { %12 = vsyncpa [#allocation4], 0 }
   0x7   :  { %14 = vsyncpa [#allocation4 + $0x1], 0 }
   0x8   :  { %15 = vsyncpa [#allocation7], 0 }
   0x9   :  { %17 = vsyncpa [#allocation7 + $0x1], 0 }
   0xa   :  { %18 = vsyncpa [#allocation10], 0 }
   0xb   :  { %20 = vsyncpa [#allocation10 + $0x1], 0 }
   0xc   :  { %21 = vsyncpa [#allocation13], 0 }
   0xd   :  { %23 = vsyncpa [#allocation13 + $0x1], 0 }
   0xe   :  { %24 = vsyncpa [#allocation5], 0 }
   0xf   :  { %26 = vsyncpa [#allocation5 + $0x1], 0  ;;  %s1974_s24 = smov 0   ;;  %s1976_s25 = smov 0  }
  0x10   :  { %s1978_s26 = smov 0   ;;  %s1980_s27 = smov 0  }
  0x11   :  { %s1982_s28 = smov 0   ;;  %s1984_s29 = smov 0  }
  0x12   :  { %s1986_s30 = smov 0   ;;  %s1988_s8 = smov 0  }
  0x13   :  { %s1990_s9 = smov 0   ;;  %s1992_s10 = smov 0  }
  0x14   :  { %s1994_s11 = smov 0  }
  0x15 LB: > { %2536 = sst [smem:[#allocation21_spill]] %s1883_s25  ;;  %s2030_s12 = sadd.s32 4294967295, %s1919_s11   ;;  %s1919_s11 = sphi %s1994_s11, %s32_s11   ;;  %s1915_s10 = sphi %s1992_s10, %s2602_s10   ;;  %s1911_s9 = sphi %s1990_s9, %s2601_s9   ;;  %s1907_s8 = sphi %s1988_s8, %s2600_s8   ;;  %s1903_s30 = sphi %s1986_s30, %s2599_s30   ;;  %s1899_s29 = sphi %s1984_s29, %s2598_s29   ;;  %s1895_s28 = sphi %s1982_s28, %s2597_s28   ;;  %s1891_s27 = sphi %s1980_s27, %s2591_s27   ;;  %s1887_s26 = sphi %s1978_s26, %s2596_s26   ;;  %s1883_s25 = sphi %s1976_s25, %s2595_s25   ;;  %s1879_s24 = sphi %s1974_s24, %s2589_s24  }
  0x16   : > { %2537 = sst [smem:[#allocation22_spill]] %s1891_s27  ;;  %s1223_s13 = sadd.s32 4294967294, %s1919_s11  }
  0x17   : > { %2538 = sst [smem:[#allocation23_spill]] %s1895_s28  ;;  %s41_s14 = sadd.s32 1, %s1911_s9 }
  0x18   : > { %2539 = sst [smem:[#allocation24_spill]] %s1903_s30  ;;  %s44_s15 = sadd.s32 1, %s1915_s10 }
  0x19   : > { %2540 = sst [smem:[#allocation25_spill]] %s1907_s8  ;;  %p42_p0 = scmp.ge.s32.totalorder %s41_s14, 2 }
  0x1a   : > { %2541 = sst [smem:[#allocation26_spill]] %s1919_s11  ;;  %s51_s16 = sadd.s32 1, %s1899_s29 }
  0x1b   : > { %2542 = sst [smem:[#allocation27_spill]] %s2030_s12  ;;  %p58_p1 = scmp.ne.s32.totalorder %s1899_s29, %s1895_s28 }
  0x1c   : > { %p59_p2 = scmp.eq.s32.totalorder %s1919_s11, 0  ;;  %s2604_s14 = smov (%p42_p0, %s41_s14), 0 }
  0x1d   : > { %2543 = sst [smem:[#allocation28_spill]] %s2604_s14  ;;  %s2606_s15 = smov (!%p42_p0, %s44_s15), %s1915_s10 }
  0x1e   : > { %p2047_p3 = por %p59_p2, %p58_p1  ;;  %p2508_p4 = scmp.ne.s32.totalorder %s1895_s28, %s1891_s27 }
  0x1f   : > { %p46_p5 = scmp.ge.s32.totalorder %s2606_s15, 2  ;;  %p65_p6 = scmp.eq.s32.totalorder %s2030_s12, 0 }
  0x20   : > { %s100_s18 = ssub.s32 %s1911_s9, %s2604_s14  ;;  %s103_s19 = sadd.s32 1, %s1887_s26 }
  0x21   : > { %s2608_s15 = smov (%p46_p5, %s2606_s15), 0  ;;  %p2064_p7 = por %p65_p6, %p2508_p4 }
  0x22   : > { %2545 = sst [smem:[#allocation29_spill]] %s2608_s15  ;;  %p101_p8 = scmp.eq.s32.totalorder %s100_s18, 0 }
  0x23   : > { %s2546_s20 = scalar_select %p2064_p7, 1, 0 }
  0x24   : > { %s48_s21 = ssub.s32 %s1915_s10, %s2608_s15  ;;  %p110_p9 = scmp.ne.s32.totalorder %s1887_s26, %s1883_s25 }
  0x25   : > { %2547 = sst [smem:[#allocation30_spill]] %s2546_s20  ;;  %p49_p10 = scmp.eq.s32.totalorder %s48_s21, 0 }
  0x26   : > { %p116_p11 = scmp.ne.s32.totalorder %s1883_s25, %s1879_s24  ;;  %p2082_p12 = por %p110_p9, %p59_p2 }
  0x27   : > { %s2075_s22 = scalar_select %p101_p8, %s1887_s26, %s103_s19  }
  0x28   : > { %s2078_s23 = scalar_select %p49_p10, %s1899_s29, %s51_s16  }
  0x29   : > { %2548 = sst [smem:[#allocation31_spill]] %s2075_s22  ;;  %p2088_p13 = por %p116_p11, %p65_p6 }
  0x2a   : > { %2549 = sst [smem:[#allocation32_spill]] %s2078_s23  ;;  %p239_p0 = scmp.eq.s32.totalorder %s2030_s12, 3 }
  0x2b   : > { %s2551_s18 = scalar_select %p2088_p13, 1, 0 }
  0x2c   : > { %p245_p5 = scmp.eq.s32.totalorder %s1223_s13, 3  ;;  %p1515_p4 = scmp.lt.s32.totalorder %s1919_s11, 4 }
  0x2d   : > { %2552 = sst [smem:[#allocation33_spill]] %s2551_s18  ;;  %p2097_p8 = por %p239_p0, %p58_p1 }
  0x2e   : > { %p2555_p10 = scmp.ne.s32.totalorder %s1895_s28, %s1891_s27  ;;  %s2515_s19 = sand.u32 1, %s1899_s29  }
  0x2f   : > { %s2553_s24 = scalar_select %p2097_p8, 1, 0 }
  0x30   : > { %p2104_p2 = por %p245_p5, %p2555_p10  ;;  %s2516_s21 = sshll.u32 %s1915_s10, 7 }
  0x31   : > { %2554 = sst [smem:[#allocation34_spill]] %s2553_s24  ;;  %s2112_s15 = sshll.u32 %s2515_s19, 3 }
  0x32   : > { %s2556_s16 = scalar_select %p2104_p2, 1, 0 }
  0x33   : > { %p2116_p6 = pnand %p1515_p4, %p2047_p3  ;;  %s2517_s23 = sand.u32 1, %s1919_s11  }
  0x34   : > { %2557 = sst [smem:[#allocation35_spill]] %s2556_s16  ;;  %s290_s16 = scalar_lea.vmem [#allocation6], %s2112_s15 }
  0x35   : > { %s2559_s1 = sld [smem:[#allocation37_spill]]  ;;  %s297_s24 = sshll.u32 %s290_s16, 4  ;;  %s298_s24 = int_to_ptr.vmem [resolvable:$true] %s297_s24 }
  0x36   : > { %p2129_p1 = pnand %p1515_p4, %p2082_p12  ;;  %s2135_s17 = scalar_lea.sflag [#allocation7], %s2517_s23 }
  0x37   : > { %p2521_p3 = pneg %p2116_p6  ;;  %s1628_s8 = scalar_lea.vmem %s298_s24, 128 }
  0x38   : > { %p1629_p9 = scmp.ne.s32.totalorder %s298_s24, %s1628_s8  ;;  %s1921_s27 = smov [#allocation6]  }
  0x39   : > { %s1633_s22 = sshll.u32 %s1921_s27, 4  ;;  %s1634_s22 = int_to_ptr.vmem [resolvable:$false] %s1633_s22 }
  0x3a   : > { %p1631_p11 = pnand %p1629_p9, %p2521_p3  ;;  %s1635_s16 = scalar_lea.vmem %s1634_s22, 256 }
  0x3b   : > { %s295_s7 = scalar_lea.hbm %s2559_s1, %s2516_s21  ;;  %p1636_p5 = scmp.lt.s32.totalorder %s298_s24, %s1634_s22 }
  0x3c   : > { %p1632_p0 = pneg %p1631_p11  ;;  %p1637_p4 = scmp.lt.s32.totalorder %s1635_s16, %s1628_s8 }
  0x3e   : > { %p1638_p12 = por %p1637_p4, %p1636_p5 }
  0x40   : > { %p1639_p10 = pnand %p1638_p12, %p1632_p0 }
  0x42   : > { %1642 = shalt.err (!%p1639_p10)
}
  0x43   : > { %1498 = dma.hbm_to_vmem [thread:$0]  (!%p2116_p6), %s295_s7, 128, %s298_s24, %s2135_s17  }
  0x44   : > { %p1239_p9 = scmp.ge.s32.totalorder %s1919_s11, 1  ;;  %p383_p11 = scmp.lt.s32.totalorder %s1919_s11, 5 }
  0x45   : > { %s2518_s14 = sand.u32 1, %s1887_s26   ;;  %s2149_s27 = sshll.u32 %s1911_s9, 7 }
  0x46   : > { %p2151_p0 = pnand %p1239_p9, %p383_p11  ;;  %s2157_s22 = sshll.u32 %s2518_s14, 7 }
  0x47   : > { %s2563_s3 = sld [smem:[#allocation38_spill]]  ;;  %s328_s1 = scalar_lea.vmem [#allocation9], %s2157_s22 }
  0x48   : > { %s2561_s8 = scalar_select %p2151_p0, 1, 0 }
  0x49   : > { %s334_s7 = sshll.u32 %s328_s1, 4  ;;  %s2564_s24 = sand.u32 1, %s1919_s11   ;;  %s335_s7 = int_to_ptr.vmem [resolvable:$true] %s334_s7 }
  0x4a   : > { %2562 = sst [smem:[#allocation36_spill]] %s2561_s8  ;;  %s2166_s6 = scalar_lea.sflag [#allocation10], %s2564_s24 }
  0x4b   : > { %p2530_p5 = pneg %p2129_p1  ;;  %s1656_s30 = scalar_lea.vmem %s335_s7, 2048 }
  0x4c   : > { %p1657_p4 = scmp.ne.s32.totalorder %s335_s7, %s1656_s30  ;;  %s1922_s14 = smov [#allocation9]  }
  0x4d   : > { %s333_s23 = scalar_lea.hbm %s2563_s3, %s2149_s27  ;;  %s1661_s18 = sshll.u32 %s1922_s14, 4  ;;  %s1662_s18 = int_to_ptr.vmem [resolvable:$false] %s1661_s18 }
  0x4e   : > { %p1659_p12 = pnand %p1657_p4, %p2530_p5  ;;  %s1663_s21 = scalar_lea.vmem %s1662_s18, 4096 }
  0x4f   : > { %p1664_p9 = scmp.lt.s32.totalorder %s335_s7, %s1662_s18  ;;  %p1665_p11 = scmp.lt.s32.totalorder %s1663_s21, %s1656_s30 }
  0x50   : > { %p1660_p10 = pneg %p1659_p12 }
  0x51   : > { %p1666_p3 = por %p1665_p11, %p1664_p9 }
  0x53   : > { %p1667_p2 = pnand %p1666_p3, %p1660_p10 }
  0x55   : > { %1670 = shalt.err (!%p1667_p2)
}
  0x56   : > { %s1923_s1 = smov 256   ;;  %s1924_s16 = smov 128  }
  0x57   : > { %s1925_s24 = smov 8   ;;  %s2565_s18 = sshll.u32 %s1915_s10, 7 }
  0x58   : > { %1504 = dma.hbm_to_vmem [thread:$0]  (!%p2129_p1), %s333_s23, 2048, %s335_s7, %s2166_s6, %s1923_s1, %s1924_s16, %s1925_s24  }
  0x59   : > { %s277_s21 = scalar_lea.hbm %s2499_s0, %s2565_s18  ;;  %s272_s3 = scalar_lea.vmem [#allocation3], %s2112_s15 }
  0x5a   : > { %s279_s11 = sshll.u32 %s272_s3, 4  ;;  %s313_s20 = scalar_lea.hbm %s2501_s2, %s2149_s27  ;;  %s280_s11 = int_to_ptr.vmem [resolvable:$true] %s279_s11 }
  0x5b   : > { %s2566_s28 = sand.u32 1, %s1899_s29   ;;  %s1684_s5 = scalar_lea.vmem %s280_s11, 128 }
  0x5c   : > { %s269_s8 = scalar_lea.sflag [#allocation4], %s2566_s28  ;;  %p1685_p2 = scmp.ne.s32.totalorder %s280_s11, %s1684_s5 }
  0x5d   : > { %p2567_p3 = pneg %p2116_p6  ;;  %s1926_s23 = smov [#allocation3]  }
  0x5e   : > { %s1689_s7 = sshll.u32 %s1926_s23, 4  ;;  %s1690_s7 = int_to_ptr.vmem [resolvable:$false] %s1689_s7 }
  0x5f   : > { %p1687_p4 = pnand %p1685_p2, %p2567_p3  ;;  %s1691_s30 = scalar_lea.vmem %s1690_s7, 256 }
  0x60   : > { %p1692_p10 = scmp.lt.s32.totalorder %s280_s11, %s1690_s7  ;;  %p1693_p9 = scmp.lt.s32.totalorder %s1691_s30, %s1684_s5 }
  0x61   : > { %p1688_p12 = pneg %p1687_p4 }
  0x62   : > { %p1694_p11 = por %p1693_p9, %p1692_p10 }
  0x64   : > { %p1695_p5 = pnand %p1694_p11, %p1688_p12 }
  0x66   : > { %1698 = shalt.err (!%p1695_p5)
}
  0x67   : > { %1495 = dma.hbm_to_vmem [thread:$0]  (!%p2116_p6), %s277_s21, 128, %s280_s11, %s269_s8  }
  0x68   : > { %s308_s3 = scalar_lea.vmem [#allocation8], %s2157_s22  ;;  %s353_s15 = scalar_lea.hbm %s2503_s4, %s2149_s27 }
  0x69   : > { %s314_s25 = sshll.u32 %s308_s3, 4  ;;  %p2568_p3 = pneg %p2129_p1  ;;  %s315_s25 = int_to_ptr.vmem [resolvable:$true] %s314_s25 }
  0x6a   : > { %s1712_s18 = scalar_lea.vmem %s315_s25, 2048  ;;  %s1927_s5 = smov [#allocation8]  }
  0x6b   : > { %p1713_p2 = scmp.ne.s32.totalorder %s315_s25, %s1712_s18  ;;  %s1717_s14 = sshll.u32 %s1927_s5, 4  ;;  %s1718_s14 = int_to_ptr.vmem [resolvable:$false] %s1717_s14 }
  0x6c   : > { %s1719_s13 = scalar_lea.vmem %s1718_s14, 4096  ;;  %p1720_p5 = scmp.lt.s32.totalorder %s315_s25, %s1718_s14 }
  0x6d   : > { %p1715_p4 = pnand %p1713_p2, %p2568_p3  ;;  %p1721_p10 = scmp.lt.s32.totalorder %s1719_s13, %s1712_s18 }
  0x6f   : > { %p1716_p12 = pneg %p1715_p4  ;;  %p1722_p6 = por %p1721_p10, %p1720_p5 }
  0x71   : > { %p1723_p9 = pnand %p1722_p6, %p1716_p12 }
  0x73   : > { %1726 = shalt.err (!%p1723_p9)
}
  0x74   : > { %1501 = dma.hbm_to_vmem [thread:$0]  (!%p2129_p1), %s313_s20, 2048, %s315_s25, %s2135_s17, %s1923_s1, %s1924_s16, %s1925_s24  }
  0x75   : > { %s348_s21 = scalar_lea.vmem [#allocation11], %s2157_s22  ;;  %p2569_p2 = pmov %p2568_p3 }
  0x76   : > { %s354_s23 = sshll.u32 %s348_s21, 4  ;;  %s1928_s30 = smov [#allocation11]   ;;  %s355_s23 = int_to_ptr.vmem [resolvable:$true] %s354_s23 }
  0x77   : > { %s1740_s7 = scalar_lea.vmem %s355_s23, 2048  ;;  %s1745_s3 = sshll.u32 %s1928_s30, 4  ;;  %s1746_s3 = int_to_ptr.vmem [resolvable:$false] %s1745_s3 }
  0x78   : > { %p1741_p11 = scmp.ne.s32.totalorder %s355_s23, %s1740_s7  ;;  %s1747_s28 = scalar_lea.vmem %s1746_s3, 4096 }
  0x79   : > { %p1748_p12 = scmp.lt.s32.totalorder %s355_s23, %s1746_s3  ;;  %p1749_p5 = scmp.lt.s32.totalorder %s1747_s28, %s1740_s7 }
  0x7a   : > { %p1743_p3 = pnand %p1741_p11, %p2569_p2 }
  0x7b   : > { %p1750_p10 = por %p1749_p5, %p1748_p12 }
  0x7c   : > { %p1744_p4 = pneg %p1743_p3 }
  0x7e   : > { %p1751_p6 = pnand %p1750_p10, %p1744_p4 }
  0x80   : > { %1754 = shalt.err (!%p1751_p6)
}
  0x81   : > { %1507 = dma.hbm_to_vmem [thread:$0]  (!%p2129_p1), %s353_s15, 2048, %s355_s23, %s2166_s6, %s1923_s1, %s1924_s16, %s1925_s24  }
  0x82   : > { %s1255_s25 = sshll.u32 %s1911_s9, 11  ;;  %s368_s12 = scalar_lea.vmem [#allocation12], %s2157_s22 }
  0x83   : > { %s375_s18 = sshll.u32 %s368_s12, 4  ;;  %s2570_s13 = sld [smem:[#allocation39_spill]]  ;;  %s376_s18 = int_to_ptr.vmem [resolvable:$true] %s375_s18 }
  0x84   : > { %s2571_s8 = sand.u32 1, %s1887_s26   ;;  %s1768_s7 = scalar_lea.vmem %s376_s18, 2048 }
  0x85   : > { %s365_s21 = scalar_lea.sflag [#allocation13], %s2571_s8  ;;  %p1769_p9 = scmp.ne.s32.totalorder %s376_s18, %s1768_s7 }
  0x86   : > { %p2572_p11 = pmov %p2569_p2  ;;  %s1929_s27 = smov [#allocation12]  }
  0x87   : > { %s1773_s30 = sshll.u32 %s1929_s27, 4  ;;  %s1774_s30 = int_to_ptr.vmem [resolvable:$false] %s1773_s30 }
  0x88   : > { %p1771_p2 = pnand %p1769_p9, %p2572_p11  ;;  %s1775_s6 = scalar_lea.vmem %s1774_s30, 4096 }
  0x89   : > { %s374_s11 = scalar_lea.hbm %s2570_s13, %s1255_s25  ;;  %p1776_p4 = scmp.lt.s32.totalorder %s376_s18, %s1774_s30 }
  0x8a   : > { %p1772_p3 = pneg %p1771_p2  ;;  %p1777_p12 = scmp.lt.s32.totalorder %s1775_s6, %s1768_s7 }
  0x8c   : > { %p1778_p5 = por %p1777_p12, %p1776_p4 }
  0x8e   : > { %p1779_p10 = pnand %p1778_p5, %p1772_p3 }
  0x90   : > { %1782 = shalt.err (!%p1779_p10)
}
  0x91   : > { %1510 = dma.hbm_to_vmem [thread:$0]  (!%p2129_p1), %s374_s11, 2048, %s376_s18, %s365_s21, %s1924_s16, %s1924_s16, %s1925_s24  }
  0x92   : > { %387 = sbr.rel (%p2151_p0) target bundleno = 1352 (0x548), region = 48  ;;  %s2574_s1 = sld [smem:[#allocation23_spill]] (!%p2151_p0) }
  0x98   : > { %s2248_s23 = sand.u32 1, %s2574_s1  }
  0x99   : > { %s2251_s3 = sshll.u32 %s2248_s23, 3  ;;  %s390_s28 = scalar_lea.sflag [#allocation4], %s2248_s23 }
  0x9a   : > { %s393_s20 = scalar_lea.vmem [#allocation3], %s2251_s3 }
  0x9b   : > { %1854 = dma.done.wait (%p2064_p7), %s390_s28, 128  }
  0x9c   : > { %1856 = vsyncadd (%p2064_p7), %s390_s28, 4294967168  ;;  %s2576_s19 = sld [smem:[#allocation27_spill]]  ;;  %s402_s17 = scalar_lea.vmem [#allocation6], %s2251_s3 }
  0xa2   : > { %s398_s16 = sand.u32 1, %s2576_s19  }
  0xa3   : > { %s399_s24 = scalar_lea.sflag [#allocation7], %s398_s16 }
  0xa4   : > { %1858 = dma.done.wait (%p2064_p7), %s399_s24, 128  }
  0xa5   : > { %1860 = vsyncadd (%p2064_p7), %s399_s24, 4294967168  ;;  %s2577_s25 = sld [smem:[#allocation21_spill]] }
  0xab   : > { %s409_s18 = sand.u32 1, %s2577_s25  }
  0xac   : > { %s1242_s5 = sshll.u32 %s409_s18, 7 }
  0xad   : > { %s2266_s14 = scalar_lea.vmem [#allocation8], %s1242_s5 }
  0xae   : > { %1862 = dma.done.wait (%p2088_p13), %s399_s24, 2048  }
  0xaf   : > { %1864 = vsyncadd (%p2088_p13), %s399_s24, 4294965248  ;;  %s417_s13 = scalar_lea.sflag [#allocation10], %s398_s16  ;;  %s2272_s11 = scalar_lea.vmem [#allocation9], %s1242_s5 }
  0xb0   : > { %1866 = dma.done.wait (%p2088_p13), %s417_s13, 4096  }
  0xb1   : > { %1868 = vsyncadd (%p2088_p13), %s417_s13, 4294963200  ;;  %s2278_s8 = scalar_lea.vmem [#allocation11], %s1242_s5  ;;  %s435_s21 = scalar_lea.sflag [#allocation13], %s409_s18 }
  0xb2   : > { %s2280_s7 = scalar_lea.vmem [#allocation12], %s1242_s5 }
  0xb3   : > { %1870 = dma.done.wait (%p2088_p13), %s435_s21, 2048  }
  0xb4   : > { %1872 = vsyncadd (%p2088_p13), %s435_s21, 4294965248  ;;  %s493_s27 = scalar_lea.vmem [#allocation14], %s2251_s3  ;;  %s2579_s30 = sld [smem:[#allocation24_spill]] }
  0xba   : > { %p1247_p7 = scmp.ne.s32.totalorder %s2579_s30, 0 }
  0xbc   : > { %498 = sbr.rel (%p1247_p7) target bundleno = 195 (0xc3), region = 76 }
  0xc1   : > { %v1930_v0 = vmov 0.0  }
  0xc2   : > { %499 = vst [vmem:[#allocation2] sm:$0xff] %v1930_v0 }
  0xc3 PF: > { %v603_v1 = vld [vmem:[%s2272_s11 + $0x78] sm:$0xff]  ;;  %v1931_v3 = vmov 0.0   ;;  %v602_v4 = vld [vmem:[%s2272_s11 + $0x70] sm:$0xff]  ;;  %v601_v6 = vld [vmem:[%s2272_s11 + $0x68] sm:$0xff]  ;;  %vm1932_vm0 = vmmov 0   ;;  %vm830_vm1 = vcmask 64512  }
  0xc4   : > { %v517_v2 = vld [vmem:[%s2266_s14 + $0x78] sm:$0xff]  ;;  %1363 = vmatprep.subr.mxu1 %v1931_v3  ;;  %1328 = vmatprep.subr.mxu0 %v1931_v3  ;;  %v516_v5 = vld [vmem:[%s2266_s14 + $0x70] sm:$0xff]  ;;  %v515_v7 = vld [vmem:[%s2266_s14 + $0x68] sm:$0xff]  ;;  %s2580_s6 = sld [smem:[#allocation24_spill]] }
  0xc5   : > { %1364 = vmatpush3.msra.mxu1 %v603_v1  ;;  %1329 = vmatpush3.msra.mxu0 %v517_v2  ;;  %v600_v8 = vld [vmem:[%s2272_s11 + $0x60] sm:$0xff]  ;;  %v599_v10 = vld [vmem:[%s2272_s11 + $0x58] sm:$0xff]  ;;  %v598_v12 = vld [vmem:[%s2272_s11 + $0x50] sm:$0xff] }
  0xc6   : > { %1365 = vmatprep.subr.mxu1 %v1931_v3  ;;  %1330 = vmatprep.subr.mxu0 %v1931_v3  ;;  %v514_v9 = vld [vmem:[%s2266_s14 + $0x60] sm:$0xff]  ;;  %v513_v11 = vld [vmem:[%s2266_s14 + $0x58] sm:$0xff]  ;;  %v512_v13 = vld [vmem:[%s2266_s14 + $0x50] sm:$0xff] }
  0xc7   : > { %1366 = vmatpush3.msra.mxu1 %v602_v4  ;;  %1331 = vmatpush3.msra.mxu0 %v516_v5  ;;  %v597_v14 = vld [vmem:[%s2272_s11 + $0x48] sm:$0xff]  ;;  %v596_v16 = vld [vmem:[%s2272_s11 + $0x40] sm:$0xff]  ;;  %v595_v18 = vld [vmem:[%s2272_s11 + $0x38] sm:$0xff] }
  0xc8   : > { %1367 = vmatprep.subr.mxu1 %v1931_v3  ;;  %1332 = vmatprep.subr.mxu0 %v1931_v3  ;;  %v511_v15 = vld [vmem:[%s2266_s14 + $0x48] sm:$0xff]  ;;  %v510_v17 = vld [vmem:[%s2266_s14 + $0x40] sm:$0xff]  ;;  %v509_v19 = vld [vmem:[%s2266_s14 + $0x38] sm:$0xff] }
  0xc9   : > { %1368 = vmatpush3.msra.mxu1 %v601_v6  ;;  %1333 = vmatpush3.msra.mxu0 %v515_v7  ;;  %v594_v20 = vld [vmem:[%s2272_s11 + $0x30] sm:$0xff]  ;;  %v593_v22 = vld [vmem:[%s2272_s11 + $0x28] sm:$0xff]  ;;  %v592_v24 = vld [vmem:[%s2272_s11 + $0x20] sm:$0xff] }
  0xca   : > { %1369 = vmatprep.subr.mxu1 %v1931_v3  ;;  %1334 = vmatprep.subr.mxu0 %v1931_v3  ;;  %v508_v21 = vld [vmem:[%s2266_s14 + $0x30] sm:$0xff]  ;;  %v507_v23 = vld [vmem:[%s2266_s14 + $0x28] sm:$0xff]  ;;  %v506_v25 = vld [vmem:[%s2266_s14 + $0x20] sm:$0xff]  ;;  %p1249_p13 = scmp.ne.s32.totalorder %s2580_s6, 1 }
  0xcb   : > { %1370 = vmatpush3.msra.mxu1 %v600_v8  ;;  %1335 = vmatpush3.msra.mxu0 %v514_v9  ;;  %v591_v26 = vld [vmem:[%s2272_s11 + $0x18] sm:$0xff]  ;;  %v590_v28 = vld [vmem:[%s2272_s11 + $0x10] sm:$0xff]  ;;  %v589_v30 = vld [vmem:[%s2272_s11 + $0x8] sm:$0xff]  ;;  %s2581_s15 = sld [smem:[#allocation40_spill]] (!%p1249_p13) }
  0xcc   : > { %1371 = vmatprep.subr.mxu1 %v1931_v3  ;;  %1336 = vmatprep.subr.mxu0 %v1931_v3  ;;  %v505_v27 = vld [vmem:[%s2266_s14 + $0x18] sm:$0xff]  ;;  %v504_v29 = vld [vmem:[%s2266_s14 + $0x10] sm:$0xff]  ;;  %v503_v31 = vld [vmem:[%s2266_s14 + $0x8] sm:$0xff] }
  0xcd   : > { %1372 = vmatpush3.msra.mxu1 %v599_v10  ;;  %1337 = vmatpush3.msra.mxu0 %v513_v11  ;;  %v588_v32 = vld [vmem:[%s2272_s11] sm:$0xff]  ;;  %v501_v33 = vld [vmem:[%s402_s17] sm:$0xff]  ;;  %v687_v38 = vld [vmem:[%s2278_s8 + $0x68] sm:$0xff] }
  0xce   : > { %1373 = vmatprep.subr.mxu1 %v1931_v3  ;;  %1338 = vmatprep.subr.mxu0 %v1931_v3  ;;  %v502_v34 = vld [vmem:[%s2266_s14] sm:$0xff]  ;;  %v689_v36 = vld [vmem:[%s2278_s8 + $0x78] sm:$0xff]  ;;  %v688_v37 = vld [vmem:[%s2278_s8 + $0x70] sm:$0xff] }
  0xcf   : > { %1374 = vmatpush3.msra.mxu1 %v598_v12  ;;  %1339 = vmatpush3.msra.mxu0 %v512_v13  ;;  %v500_v35 = vld [vmem:[%s393_s20] sm:$0xff]  ;;  %v685_v40 = vld [vmem:[%s2278_s8 + $0x58] sm:$0xff]  ;;  %v684_v41 = vld [vmem:[%s2278_s8 + $0x50] sm:$0xff] }
  0xd0   : > { %1375 = vmatprep.subr.mxu1 %v1931_v3  ;;  %1340 = vmatprep.subr.mxu0 %v1931_v3  ;;  %v686_v39 = vld [vmem:[%s2278_s8 + $0x60] sm:$0xff]  ;;  %v683_v42 = vld [vmem:[%s2278_s8 + $0x48] sm:$0xff]  ;;  %v681_v44 = vld [vmem:[%s2278_s8 + $0x38] sm:$0xff] }
  0xd1   : > { %1376 = vmatpush3.msra.mxu1 %v597_v14  ;;  %1341 = vmatpush3.msra.mxu0 %v511_v15  ;;  %v682_v43 = vld [vmem:[%s2278_s8 + $0x40] sm:$0xff]  ;;  %v680_v45 = vld [vmem:[%s2278_s8 + $0x30] sm:$0xff]  ;;  %v679_v46 = vld [vmem:[%s2278_s8 + $0x28] sm:$0xff] }
  0xd2   : > { %1377 = vmatprep.subr.mxu1 %v1931_v3  ;;  %1342 = vmatprep.subr.mxu0 %v1931_v3  ;;  %v678_v47 = vld [vmem:[%s2278_s8 + $0x20] sm:$0xff]  ;;  %v677_v48 = vld [vmem:[%s2278_s8 + $0x18] sm:$0xff]  ;;  %v676_v49 = vld [vmem:[%s2278_s8 + $0x10] sm:$0xff] }
  0xd3   : > { %1378 = vmatpush3.msra.mxu1 %v596_v16  ;;  %1343 = vmatpush3.msra.mxu0 %v510_v17  ;;  %v675_v50 = vld [vmem:[%s2278_s8 + $0x8] sm:$0xff]  ;;  %v674_v51 = vld [vmem:[%s2278_s8] sm:$0xff]  ;;  %v931_v6 = vld [vmem:[%s2280_s7 + $0x78] sm:$0xff] }
  0xd4   : > { %1379 = vmatprep.subr.mxu1 %v1931_v3  ;;  %1344 = vmatprep.subr.mxu0 %v1931_v3  ;;  %v930_v7 = vld [vmem:[%s2280_s7 + $0x70] sm:$0xff]  ;;  %v929_v8 = vld [vmem:[%s2280_s7 + $0x68] sm:$0xff]  ;;  %v928_v9 = vld [vmem:[%s2280_s7 + $0x60] sm:$0xff] }
  0xd5   : > { %1380 = vmatpush3.msra.mxu1 %v595_v18  ;;  %1345 = vmatpush3.msra.mxu0 %v509_v19  ;;  %v927_v10 = vld [vmem:[%s2280_s7 + $0x58] sm:$0xff]  ;;  %v926_v11 = vld [vmem:[%s2280_s7 + $0x50] sm:$0xff]  ;;  %v925_v12 = vld [vmem:[%s2280_s7 + $0x48] sm:$0xff] }
  0xd6   : > { %1381 = vmatprep.subr.mxu1 %v1931_v3  ;;  %1346 = vmatprep.subr.mxu0 %v1931_v3  ;;  %v924_v13 = vld [vmem:[%s2280_s7 + $0x40] sm:$0xff]  ;;  %v923_v14 = vld [vmem:[%s2280_s7 + $0x38] sm:$0xff]  ;;  %v922_v15 = vld [vmem:[%s2280_s7 + $0x30] sm:$0xff] }
  0xd7   : > { %1382 = vmatpush3.msra.mxu1 %v594_v20  ;;  %1347 = vmatpush3.msra.mxu0 %v508_v21  ;;  %v921_v16 = vld [vmem:[%s2280_s7 + $0x28] sm:$0xff]  ;;  %v920_v17 = vld [vmem:[%s2280_s7 + $0x20] sm:$0xff]  ;;  %v919_v18 = vld [vmem:[%s2280_s7 + $0x18] sm:$0xff] }
  0xd8   : > { %1383 = vmatprep.subr.mxu1 %v1931_v3  ;;  %1348 = vmatprep.subr.mxu0 %v1931_v3  ;;  %v918_v19 = vld [vmem:[%s2280_s7 + $0x10] sm:$0xff]  ;;  %v917_v20 = vld [vmem:[%s2280_s7 + $0x8] sm:$0xff]  ;;  %v916_v21 = vld [vmem:[%s2280_s7] sm:$0xff] }
  0xd9   : > { %1384 = vmatpush3.msra.mxu1 %v593_v22  ;;  %1349 = vmatpush3.msra.mxu0 %v507_v23 }
  0xda   : > { %1385 = vmatprep.subr.mxu1 %v1931_v3  ;;  %1350 = vmatprep.subr.mxu0 %v1931_v3 }
  0xdb   : > { %1386 = vmatpush3.msra.mxu1 %v592_v24  ;;  %1351 = vmatpush3.msra.mxu0 %v506_v25  ;;  %v915_v24 = vld [vmem:[#allocation2] sm:$0xff] }
  0xdc   : > { %1387 = vmatprep.subr.mxu1 %v1931_v3  ;;  %1352 = vmatprep.subr.mxu0 %v1931_v3 }
  0xdd   : > { %1388 = vmatpush3.msra.mxu1 %v591_v26  ;;  %1353 = vmatpush3.msra.mxu0 %v505_v27 }
  0xde   : > { %1389 = vmatprep.subr.mxu1 %v1931_v3  ;;  %1354 = vmatprep.subr.mxu0 %v1931_v3 }
  0xdf   : > { %1390 = vmatpush3.msra.mxu1 %v590_v28  ;;  %1355 = vmatpush3.msra.mxu0 %v504_v29 }
  0xe0   : > { %1391 = vmatprep.subr.mxu1 %v1931_v3  ;;  %1356 = vmatprep.subr.mxu0 %v1931_v3 }
  0xe1   : > { %1392 = vmatpush3.msra.mxu1 %v589_v30  ;;  %1357 = vmatpush3.msra.mxu0 %v503_v31 }
  0xe2   : > { %1393 = vmatprep.subr.mxu1 %v1931_v3  ;;  %1395 = vmatprep.mubr.msk.f32.mxu1 %vm1932_vm0, %v1931_v3 }
  0xe3   : > { %1394 = vmatpush3.msra.mxu1 %v588_v32  ;;  %1358 = vmatprep.subr.mxu0 %v1931_v3 }
  0xe4   : > { %1396 = vmatmul.mubr.f32.vlgmr.msra.gmra.mxu1 %v501_v33  ;;  %1359 = vmatpush3.msra.mxu0 %v502_v34 }
  0xe5   : > { %1360 = vmatprep.mubr.msk.f32.mxu0 %vm1932_vm0, %v1931_v3  ;;  %1398 = vmatprep.subr.mxu0 %v1931_v3 }
  0xe6   : > { %1361 = vmatmul.mubr.f32.vlgmr.msra.gmra.mxu0 %v500_v35  ;;  %1438 = vmatprep.subr.mxu1 %v1931_v3 }
  0xe7   : > { %1399 = vmatpush3.msra.mxu0 %v689_v36  ;;  %1430 = vmatprep.mubr.msk.f32.mxu0 %vm1932_vm0, %v1931_v3 }
  0xe8   : > { %1400 = vmatprep.subr.mxu0 %v1931_v3  ;;  %1440 = vmatprep.mubr.msk.f32.mxu1 %vm1932_vm0, %v1931_v3 }
  0xe9   : > { %1401 = vmatpush3.msra.mxu0 %v688_v37 }
  0xea   : > { %1402 = vmatprep.subr.mxu0 %v1931_v3 }
  0xeb   : > { %1403 = vmatpush3.msra.mxu0 %v687_v38 }
  0xec   : > { %1404 = vmatprep.subr.mxu0 %v1931_v3 }
  0xed   : > { %1405 = vmatpush3.msra.mxu0 %v686_v39 }
  0xee   : > { %1406 = vmatprep.subr.mxu0 %v1931_v3 }
  0xef   : > { %1407 = vmatpush3.msra.mxu0 %v685_v40 }
  0xf0   : > { %1408 = vmatprep.subr.mxu0 %v1931_v3 }
  0xf1   : > { %1409 = vmatpush3.msra.mxu0 %v684_v41 }
  0xf2   : > { %1410 = vmatprep.subr.mxu0 %v1931_v3 }
  0xf3   : > { %1411 = vmatpush3.msra.mxu0 %v683_v42 }
  0xf4   : > { %1412 = vmatprep.subr.mxu0 %v1931_v3 }
  0xf5   : > { %1413 = vmatpush3.msra.mxu0 %v682_v43 }
  0xf6   : > { %1414 = vmatprep.subr.mxu0 %v1931_v3 }
  0xf7   : > { %1415 = vmatpush3.msra.mxu0 %v681_v44 }
  0xf8   : > { %1416 = vmatprep.subr.mxu0 %v1931_v3 }
  0xf9   : > { %1417 = vmatpush3.msra.mxu0 %v680_v45 }
  0xfa   : > { %1418 = vmatprep.subr.mxu0 %v1931_v3 }
  0xfb   : > { %1419 = vmatpush3.msra.mxu0 %v679_v46 }
  0xfc   : > { %1420 = vmatprep.subr.mxu0 %v1931_v3 }
  0xfd   : > { %1421 = vmatpush3.msra.mxu0 %v678_v47 }
  0xfe   : > { %1422 = vmatprep.subr.mxu0 %v1931_v3 }
  0xff   : > { %1423 = vmatpush3.msra.mxu0 %v677_v48 }
 0x100   : > { %1424 = vmatprep.subr.mxu0 %v1931_v3 }
 0x101   : > { %1425 = vmatpush3.msra.mxu0 %v676_v49 }
 0x102   : > { %1426 = vmatprep.subr.mxu0 %v1931_v3 }
 0x103   : > { %1427 = vmatpush3.msra.mxu0 %v675_v50 }
 0x104   : > { %1428 = vmatprep.subr.mxu0 %v1931_v3 }
 0x105   : > { %1429 = vmatpush3.msra.mxu0 %v674_v51 }
 0x106   : > { %1431 = vmatmul.mubr.f32.vlgmr.msra.gmra.mxu0 %v501_v33  ;;  %1433 = vmatprep.subr.mxu0 %v1931_v3 }
 0x107   : > { %1435 = vmatprep.mubr.msk.f32.mxu0 %vm1932_vm0, %v1931_v3 }
 0x1a4   : > { %v670_v52 = vpop.f32.mrf.mxu1 }
 0x1a5   : > { %1434 = vmatpush3.xpose.msra.mxu0 %v670_v52 }
 0x1a6   : > { %v584_v53 = vpop.f32.mrf.mxu0  ;;  %v1397_v54 = vpop.f32.mrf.mxu1 }
 0x1a8   : > { %v1362_v55 = vpop.f32.mrf.mxu0  ;;  %1436 = vmatmul.mubr.f32.vlgmr.msra.gmra.mxu0 %v584_v53 }
 0x1c6   : > { %v756_v56 = vpop.f32.mrf.mxu0 }
 0x1c7   : > { %1439 = vmatpush3.msra.mxu1 %v756_v56 }
 0x1c8   : > { %v1432_v57 = vpop.f32.mrf.mxu0  ;;  %1443 = vmatprep.subr.mxu1 %v1931_v3 }
 0x268   : > { %v826_v58 = vpop.f32.mrf.mxu0 }
 0x269   : > { %v831_v59 = vsel %vm830_vm1, %v826_v58, -inf }
 0x26a   : > { %832 = vmax.xlane.f32.xlu0 %v831_v59  ;;  %v1437_v60 = vpop.f32.mrf.mxu0 }
 0x2f3   : > { %v833_v61 = vpop.xlane.xlu0 %832 }
 0x2f4   : > { %v834_v62 = vsub.f32 %v826_v58, %v833_v61 }
 0x2f6   : > { %v835_v63 = vmul.f32 1.442695, %v834_v62 }
 0x2f8   : > { %1611 = vpow2.f32 %v835_v63 }
 0x305   : > { %v1612_v0 = vpop.eup %1611 }
 0x306   : > { %v837_v1 = vsel %vm830_vm1, %v1612_v0, 0.0 }
 0x307   : > { %838 = vadd.xlane.f32.xlu0 %v837_v1 }
 0x390   : > { %v839_v2 = vpop.xlane.xlu0 %838 }
 0x391   : > { %1613 = vrcp.f32 %v839_v2 }
 0x39e   : > { %v1614_v4 = vpop.eup %1613 }
 0x39f   : > { %v841_v5 = vmul.f32 %v1614_v4, %v1612_v0 }
 0x3a1   : > { %1441 = vmatmul.mubr.msk.f32.vlgmr.msra.gmra.mxu1 %vm830_vm1, %v841_v5 }
 0x3a2   : > { %1444 = vmatpush3.msra.mxu1 %v931_v6  ;;  %1475 = vmatprep.mubr.msk.f32.mxu1 %vm1932_vm0, %v1931_v3 }
 0x3a3   : > { %1445 = vmatprep.subr.mxu1 %v1931_v3 }
 0x3a4   : > { %1446 = vmatpush3.msra.mxu1 %v930_v7 }
 0x3a5   : > { %1447 = vmatprep.subr.mxu1 %v1931_v3 }
 0x3a6   : > { %1448 = vmatpush3.msra.mxu1 %v929_v8 }
 0x3a7   : > { %1449 = vmatprep.subr.mxu1 %v1931_v3 }
 0x3a8   : > { %1450 = vmatpush3.msra.mxu1 %v928_v9 }
 0x3a9   : > { %1451 = vmatprep.subr.mxu1 %v1931_v3 }
 0x3aa   : > { %1452 = vmatpush3.msra.mxu1 %v927_v10 }
 0x3ab   : > { %1453 = vmatprep.subr.mxu1 %v1931_v3 }
 0x3ac   : > { %1454 = vmatpush3.msra.mxu1 %v926_v11 }
 0x3ad   : > { %1455 = vmatprep.subr.mxu1 %v1931_v3 }
 0x3ae   : > { %1456 = vmatpush3.msra.mxu1 %v925_v12 }
 0x3af   : > { %1457 = vmatprep.subr.mxu1 %v1931_v3 }
 0x3b0   : > { %1458 = vmatpush3.msra.mxu1 %v924_v13 }
 0x3b1   : > { %1459 = vmatprep.subr.mxu1 %v1931_v3 }
 0x3b2   : > { %1460 = vmatpush3.msra.mxu1 %v923_v14 }
 0x3b3   : > { %1461 = vmatprep.subr.mxu1 %v1931_v3 }
 0x3b4   : > { %1462 = vmatpush3.msra.mxu1 %v922_v15 }
 0x3b5   : > { %1463 = vmatprep.subr.mxu1 %v1931_v3 }
 0x3b6   : > { %1464 = vmatpush3.msra.mxu1 %v921_v16 }
 0x3b7   : > { %1465 = vmatprep.subr.mxu1 %v1931_v3 }
 0x3b8   : > { %1466 = vmatpush3.msra.mxu1 %v920_v17 }
 0x3b9   : > { %1467 = vmatprep.subr.mxu1 %v1931_v3 }
 0x3ba   : > { %1468 = vmatpush3.msra.mxu1 %v919_v18 }
 0x3bb   : > { %1469 = vmatprep.subr.mxu1 %v1931_v3 }
 0x3bc   : > { %1470 = vmatpush3.msra.mxu1 %v918_v19 }
 0x3bd   : > { %1471 = vmatprep.subr.mxu1 %v1931_v3 }
 0x3be   : > { %1472 = vmatpush3.msra.mxu1 %v917_v20 }
 0x3bf   : > { %1473 = vmatprep.subr.mxu1 %v1931_v3 }
 0x3c0   : > { %1474 = vmatpush3.msra.mxu1 %v916_v21 }
 0x461   : > { %v911_v22 = vpop.f32.mrf.mxu1 }
 0x462   : > { %1476 = vmatmul.mubr.f32.vlgmr.msra.gmra.mxu1 %v911_v22 }
 0x463   : > { %v1442_v23 = vpop.f32.mrf.mxu1 }
 0x521   : > { %1007 = sbr.rel (%p1249_p13) target bundleno = 1328 (0x530), region = 80 }
 0x522   : > { %v998_v25 = vpop.f32.mrf.mxu1 }
 0x523   : > { %v1002_v26 = vadd.f32 %v998_v25, %v915_v24 }
 0x524   : > { %v1477_v27 = vpop.f32.mrf.mxu1 }
 0x525   : > { %1003 = vst [vmem:[#allocation2] sm:$0xff] %v1002_v26 }
 0x526   : > { %v1250_v29 = vld [vmem:[%s2581_s15] ss:$0 sm:$0xff] }
 0x52c   : > { %v1008_v28 = vld [vmem:[#allocation2] sm:$0xff] }
 0x52d   : > { %v1016_v3 = vadd.f32 %v1250_v29, %v1008_v28 }
 0x52f   : > { %1017 = vst [vmem:[%s493_s27] sm:$0xff] %v1016_v3 }
 0x530 PF: > { %s2582_s28 = sld [smem:[#allocation25_spill]]  ;;  %s1032_s12 = sshll.u32 %s493_s27, 4  ;;  %s1033_s12 = int_to_ptr.vmem [resolvable:$true] %s1032_s12 }
 0x531   : > { %s2584_s17 = sld [smem:[#allocation41_spill]]  ;;  %s1019_s18 = scalar_lea.sflag [#allocation5], %s2248_s23 }
 0x532   : > { %s1783_s5 = scalar_lea.vmem %s1033_s12, 128  ;;  %s1933_s14 = smov [#allocation14]  }
 0x533   : > { %p1784_p1 = scmp.ne.s32.totalorder %s1033_s12, %s1783_s5  ;;  %s1787_s13 = sshll.u32 %s1933_s14, 4  ;;  %s1788_s13 = int_to_ptr.vmem [resolvable:$false] %s1787_s13 }
 0x534   : > { %s1789_s11 = scalar_lea.vmem %s1788_s13, 256  ;;  %p1790_p9 = scmp.lt.s32.totalorder %s1033_s12, %s1788_s13 }
 0x535   : > { %p1785_p0 = pnand %p1784_p1, %p2097_p8  ;;  %p1791_p11 = scmp.lt.s32.totalorder %s1789_s11, %s1783_s5 }
 0x536   : > { %s1252_s19 = sshll.u32 %s2582_s28, 7 }
 0x537   : > { %s1030_s25 = scalar_lea.hbm %s2584_s17, %s1252_s19  ;;  %p1786_p6 = pneg %p1785_p0 }
 0x538   : > { %p1792_p2 = por %p1791_p11, %p1790_p9 }
 0x53a   : > { %p1793_p3 = pnand %p1792_p2, %p1786_p6 }
 0x53c   : > { %1796 = shalt.err (!%p1793_p3)
}
 0x53d   : > { %s1797_s8 = scalar_lea.hbm %s1030_s25, 128  ;;  %s1801_s21 = scalar_lea.hbm %s2584_s17, 256 }
 0x53e   : > { %p1798_p4 = scmp.ne.s32.totalorder %s1030_s25, %s1797_s8  ;;  %p1802_p10 = scmp.lt.s32.totalorder %s1030_s25, %s2584_s17 }
 0x53f   : > { %p1803_p7 = scmp.lt.s32.totalorder %s1801_s21, %s1797_s8 }
 0x540   : > { %p1799_p12 = pnand %p1798_p4, %p2097_p8 }
 0x541   : > { %p1804_p13 = por %p1803_p7, %p1802_p10 }
 0x542   : > { %p1800_p5 = pneg %p1799_p12 }
 0x544   : > { %p1805_p1 = pnand %p1804_p13, %p1800_p5 }
 0x546   : > { %1808 = shalt.err (!%p1805_p1)
}
 0x547   : > { %1490 = dma.vmem_to_hbm [thread:$0]  (%p2097_p8), %s1033_s12, 128, %s1030_s25, %s1019_s18  }
 0x548 PF: > { %s2585_s30 = sld [smem:[#allocation26_spill]] }
 0x549   : > { %s2586_s6 = sld [smem:[#allocation22_spill]] }
 0x54a   : > { %s2587_s22 = sld [smem:[#allocation35_spill]] }
 0x54e   : > { %p1516_p0 = scmp.ge.s32.totalorder %s2585_s30, 2 }
 0x54f   : > { %s1044_s1 = sand.u32 1, %s2586_s6  }
 0x550   : > { %p2588_p6 = scmp.ne.s32.totalorder %s2587_s22, 0  ;;  %s1045_s15 = scalar_lea.sflag [#allocation5], %s1044_s1 }
 0x552   : > { %p1512_p9 = pnand %p1516_p0, %p2588_p6 }
 0x554   : > { %p1513_p11 = pneg %p1512_p9 }
 0x556   : > { %1874 = dma.done.wait (%p1513_p11), %s1045_s15, 128  }
 0x557   : > { %1876 = vsyncadd (%p1513_p11), %s1045_s15, 4294967168  ;;  %s32_s11 = sadd.s32 1, %s2585_s30   ;;  %s2589_s24 = sld [smem:[#allocation21_spill]] }
 0x558   : > { %p29_p2 = scmp.ge.s32.totalorder %s32_s11, 6   ;;  %s2590_s28 = sld [smem:[#allocation31_spill]] }
 0x559   : > { %s2591_s27 = sld [smem:[#allocation23_spill]]  ;;  %s2595_s25 = smov %s1887_s26 }
 0x55a   : > { %s2592_s20 = sld [smem:[#allocation32_spill]]  ;;  %s2599_s30 = smov %s1911_s9 }
 0x55b   : > { %s2593_s19 = sld [smem:[#allocation28_spill]]  ;;  %s2600_s8 = smov %s1915_s10 }
 0x55c   : > { %s2594_s16 = sld [smem:[#allocation29_spill]] }
 0x55e   : > { %s2596_s26 = smov %s2590_s28  ;;  %s2597_s28 = smov %s1899_s29 }
 0x55f   :  { %31 = sbr.rel (!%p29_p2) target bundleno = 21 (0x15), region = 162 }
 0x560   : > { %s2598_s29 = smov %s2592_s20 }
 0x561   : > { %s2601_s9 = smov %s2593_s19 }
 0x562   : > { %s2602_s10 = smov %s2594_s16 }
 0x564   :  { %1050 = vsyncpa [#allocation4], 1 }
 0x565   :  { %1052 = vsyncpa [#allocation4 + $0x1], 1 }
 0x566   :  { %1053 = vsyncpa [#allocation7], 1 }
 0x567   :  { %1055 = vsyncpa [#allocation7 + $0x1], 1 }
 0x568   :  { %1056 = vsyncpa [#allocation10], 1 }
 0x569   :  { %1058 = vsyncpa [#allocation10 + $0x1], 1 }
 0x56a   :  { %1059 = vsyncpa [#allocation13], 1 }
 0x56b   :  { %1061 = vsyncpa [#allocation13 + $0x1], 1 }
 0x56c   :  { %1062 = vsyncpa [#allocation5], 1 }
 0x56d   :  { %1064 = vsyncpa [#allocation5 + $0x1], 1 }

</bundles_post_ra>
